<compile_context>
chip_gen: v7x
topology: tpu7x:2x2x1
jax: 0.10.0
libtpu: 0.0.40
codegen_flags: <defaults>
</compile_context>

<pallas_src>
import functools

import jax
import jax.numpy as jnp
import numpy as np
from jax import lax
from jax.experimental import pallas as pl
from jax.experimental.pallas import tpu as pltpu

POS_LIMIT = 100.0
NEG_LIMIT = -100.0


def _choose_tile_rows(n_rows, hidden, itemsize, *,
                      x_budget_bytes=16 * 1024 * 1024,
                      min_tile_bytes=2 * 1024 * 1024,
                      target_grid=4):
    """Row tile for the reps stream.

    * the double-buffered PAIR of reps tiles stays inside `x_budget_bytes`
      (safe on v7x's 64 MiB VMEM as well as v5e/v6e),
    * tiles stay >= ~2 MiB when the data allows it (HBM pipelining plateau),
    * prefer >= `target_grid` grid steps so the "parallel" grid axis can be
      sharded across v7x's two TensorCores,
    * always a multiple of 128 (lane-dense score blocks; packed-sublane safe
      for bf16 / int8 reps dtypes).
    """
    row_bytes = hidden * itemsize
    # Hard cap: double-buffered reps tiles must fit the VMEM budget.
    cap = max(128, (x_budget_bytes // (2 * row_bytes)) // 128 * 128)
    # Never (much) bigger than the data itself.
    rows128 = -(-n_rows // 128) * 128
    cap = min(cap, rows128)
    # Prefer target_grid steps, but keep tiles above the pipelining floor.
    want_split = -(-n_rows // target_grid)
    want_floor = -(-min_tile_bytes // row_bytes)
    want = -(-max(want_split, want_floor) // 128) * 128
    return int(max(128, min(cap, want)))


def _filter_kernel(x_ref, wd_ref, b_ref, code_ref, score_ref, part_ref, *,
                   pos_limit, neg_limit):
    # w_diff (1, H) contracted with the reps tile (TM, H) over H -> (1, TM):
    # per-row score-logit difference, lane-dense along rows (the standard
    # attention-scores q @ k^T MXU pattern, so no post-matmul relayout).
    s = lax.dot_general(
        wd_ref[...], x_ref[...],
        dimension_numbers=(((1,), (1,)), ((), ())),
        preferred_element_type=jnp.float32)            # (1, TM) f32
    s = s + b_ref[0, 0]                                # SMEM scalar bias diff

    code = code_ref[...]                               # (1, TM) int32
    maskb = (code & 1) > 0                             # bit0: rep is used
    labelb = (code & 2) > 0                            # bit1: positive label

    # --- filter score: mask fill -> clamp -> teacher forcing (torch order) ---
    score = jnp.where(maskb, s, neg_limit)
    score = jnp.clip(score, neg_limit, pos_limit)
    score = jnp.where(labelb, pos_limit, score)
    score_ref[...] = score.astype(score_ref.dtype)     # lane-dense store

    # --- 2-class cross entropy via stable softplus(+-s) ---
    # label==0: ce = softplus(s); label==1: ce = softplus(-s).
    # Garbage rows of a partial last reps tile carry mask=0, and jnp.where is
    # a SELECT, so NaN/Inf garbage never reaches the sum.
    z = jnp.where(labelb, -s, s)
    ce = jnp.maximum(z, 0.0) + jnp.log(1.0 + jnp.exp(-jnp.abs(z)))
    ce = jnp.where(maskb, ce, 0.0)

    # One lane-dense partial-sum block per grid step (no serial accumulator,
    # so the grid axis stays "parallel" for megacore sharding).
    tile_sum = jnp.sum(ce, axis=-1, keepdims=True)     # (1, 1)
    part_ref[...] = jnp.broadcast_to(tile_sum, part_ref.shape)


def filtering_layer_forward(reps, masks, binary_labels, weight, bias,
                            pos_limit=POS_LIMIT, neg_limit=NEG_LIMIT):
    """reps: (B, N, H) float (f32 or bf16, streamed once in native dtype);
    masks / binary_labels: (B, N) bool;
    weight: (H, 2) float (transpose of the PyTorch (2, H) Linear weight);
    bias: (2,) float."""
    B, N, H = reps.shape
    M = B * N

    x = reps.reshape(M, H)                     # free reshape, no copy / upcast
    itemsize = jnp.dtype(x.dtype).itemsize
    TM = _choose_tile_rows(M, H, itemsize)
    G = pl.cdiv(M, TM)
    Mp = G * TM

    # Merge mask + label into one lane-dense int32 code row (bit0 = mask,
    # bit1 = label).  Only this tiny array is padded; padded entries have
    # mask=0, so out-of-bounds tail rows of the last reps tile never reach
    # the loss or a kept score.
    code = (masks.reshape(M).astype(jnp.int32)
            + 2 * binary_labels.reshape(M).astype(jnp.int32))
    code = jnp.pad(code, (0, Mp - M)).reshape(1, Mp)

    # Collapse the 2-class head: both score and CE depend only on the class
    # difference.  (Computing the diff in f32 then casting is not bit-
    # identical to a per-class bf16 matmul followed by subtraction, but the
    # error is tiny.)
    wd = (weight[:, 1] - weight[:, 0]).reshape(1, H).astype(x.dtype)
    bd = (bias[1] - bias[0]).reshape(1, 1).astype(jnp.float32)

    kernel = functools.partial(_filter_kernel,
                               pos_limit=float(pos_limit),
                               neg_limit=float(neg_limit))

    score, part = pl.pallas_call(
        kernel,
        out_shape=(
            jax.ShapeDtypeStruct((1, Mp), reps.dtype),        # lane-dense scores
            jax.ShapeDtypeStruct((1, 128 * G), jnp.float32),  # per-tile CE sums
        ),
        grid_spec=pltpu.PrefetchScalarGridSpec(
            num_scalar_prefetch=0,
            grid=(G,),
            in_specs=[
                pl.BlockSpec((TM, H), lambda i: (i, 0)),      # reps tile (native dtype)
                pl.BlockSpec((1, H), lambda i: (0, 0)),       # w_diff row
                pl.BlockSpec(memory_space=pltpu.MemorySpace.SMEM),  # b_diff scalar
                pl.BlockSpec((1, TM), lambda i: (0, i)),      # merged mask/label code
            ],
            out_specs=[
                pl.BlockSpec((1, TM), lambda i: (0, i)),      # score row chunk
                pl.BlockSpec((1, 128), lambda i: (0, i)),     # partial-sum block
            ],
        ),
        compiler_params=pltpu.CompilerParams(
            dimension_semantics=("parallel",),                # independent tiles
            vmem_limit_bytes=40 * 1024 * 1024),
    )(x, wd, bd, code)

    filter_score = score[0, :M].reshape(B, N)
    loss_sum = part.reshape(G, 128)[:, 0].sum()               # one value per tile
    cnt = jnp.maximum(masks.sum(), 1).astype(jnp.float32)     # 'mean' reduction
    filter_loss = loss_sum / cnt
    return filter_score, filter_loss


if __name__ == "__main__":
    key = jax.random.PRNGKey(0)
    B, N, H = 2, 8, 32
    k1, k2, k3, k4 = jax.random.split(key, 4)

    reps = jax.random.normal(k1, (B, N, H), jnp.float32)
    masks = jax.random.bernoulli(k2, 0.8, (B, N))
    binary_labels = jax.random.bernoulli(k3, 0.3, (B, N))

    # Deterministic xavier_uniform_ for nn.Linear(hidden, 2): weight (2, H), bias 0.
    bound = float(np.sqrt(6.0 / (H + 2)))
    w_pt = jax.random.uniform(k4, (2, H), jnp.float32, -bound, bound)
    weight = w_pt.T            # (H, 2) for the kernel
    bias = jnp.zeros((2,), jnp.float32)

    filter_score, filter_loss = filtering_layer_forward(
        reps, masks, binary_labels, weight, bias)
    jax.block_until_ready((filter_score, filter_loss))

    # Pure-JAX reference (mirrors the torch forward with defaults:
    # force_pos_cases=True, reduction='mean', loss_only=False, dropout=None).
    logits = jnp.einsum('bnh,hc->bnc', reps, weight) + bias
    ref_score = logits[..., 1] - logits[..., 0]
    ref_score = jnp.where(masks, ref_score, NEG_LIMIT)
    ref_score = jnp.clip(ref_score, NEG_LIMIT, POS_LIMIT)
    ref_score = jnp.where(binary_labels, POS_LIMIT, ref_score)
    lse = jax.scipy.special.logsumexp(logits, axis=-1)
    sel = jnp.where(binary_labels, logits[..., 1], logits[..., 0])
    ce = jnp.where(masks, lse - sel, 0.0)
    ref_loss = ce.sum() / jnp.maximum(masks.sum(), 1)

    assert np.allclose(np.asarray(filter_score), np.asarray(ref_score),
                       rtol=1e-4, atol=1e-4)
    assert np.allclose(float(filter_loss), float(ref_loss), rtol=1e-5, atol=1e-5)

    print("KERNEL_OK")
</pallas_src>

<mosaic_0001>
module attributes {stable_mosaic.version = 11 : i64} {
  func.func @_filter_kernel(%arg0: i32, %arg1: memref<128x32xf32, #tpu.memory_space<vmem>>, %arg2: memref<1x32xf32, #tpu.memory_space<vmem>>, %arg3: memref<1x1xf32, #tpu.memory_space<smem>>, %arg4: memref<1x128xi32, #tpu.memory_space<vmem>>, %arg5: memref<1x128xf32, #tpu.memory_space<vmem>>, %arg6: memref<1x128xf32, #tpu.memory_space<vmem>>) attributes {dimension_semantics = [#tpu.dimension_semantics<parallel>], iteration_bounds = array<i64: 1>, scalar_prefetch = 0 : i64, scratch_operands = 0 : i64, tpu.core_type = #tpu.core_type<tc>, window_params = [{transform_indices = @transform_0, window_bounds = array<i64: 128, 32>}, {pipeline_mode = #tpu.pipeline_mode<synchronous>, transform_indices = @transform_1, window_bounds = array<i64: 1, 32>}, {transform_indices = @transform_2, window_bounds = array<i64: 1, 1>}, {transform_indices = @transform_3, window_bounds = array<i64: 1, 128>}, {transform_indices = @transform_4, window_bounds = array<i64: 1, 128>}, {transform_indices = @transform_5, window_bounds = array<i64: 1, 128>}]} {
    %c0 = arith.constant 0 : index
    %c0_0 = arith.constant 0 : index
    %0 = vector.load %arg2[%c0, %c0_0] : memref<1x32xf32, #tpu.memory_space<vmem>>, vector<1x32xf32>
    %c0_1 = arith.constant 0 : index
    %c0_2 = arith.constant 0 : index
    %1 = vector.load %arg1[%c0_1, %c0_2] : memref<128x32xf32, #tpu.memory_space<vmem>>, vector<128x32xf32>
    %cst = arith.constant dense<0.000000e+00> : vector<1x128xf32>
    %2 = tpu.matmul %0, %1, %cst {dimension_numbers = #tpu.dot_dimension_numbers<[1], [1], [0], [0], [0, 0, 1, 0], [], []>} : vector<1x32xf32>, vector<128x32xf32>, vector<1x128xf32> -> vector<1x128xf32>
    %c0_3 = arith.constant 0 : index
    %c0_4 = arith.constant 0 : index
    %3 = memref.load %arg3[%c0_3, %c0_4] : memref<1x1xf32, #tpu.memory_space<smem>>
    %4 = vector.broadcast %3 : f32 to vector<1x128xf32>
    %5 = arith.addf %2, %4 : vector<1x128xf32>
    %c0_5 = arith.constant 0 : index
    %c0_6 = arith.constant 0 : index
    %6 = vector.load %arg4[%c0_5, %c0_6] : memref<1x128xi32, #tpu.memory_space<vmem>>, vector<1x128xi32>
    %c1_i32 = arith.constant 1 : i32
    %7 = vector.broadcast %c1_i32 : i32 to vector<1x128xi32>
    %8 = arith.andi %6, %7 : vector<1x128xi32>
    %c0_i32 = arith.constant 0 : i32
    %9 = vector.broadcast %c0_i32 : i32 to vector<1x128xi32>
    %10 = arith.cmpi sgt, %8, %9 : vector<1x128xi32>
    %c2_i32 = arith.constant 2 : i32
    %11 = vector.broadcast %c2_i32 : i32 to vector<1x128xi32>
    %12 = arith.andi %6, %11 : vector<1x128xi32>
    %c0_i32_7 = arith.constant 0 : i32
    %13 = vector.broadcast %c0_i32_7 : i32 to vector<1x128xi32>
    %14 = arith.cmpi sgt, %12, %13 : vector<1x128xi32>
    %cst_8 = arith.constant -1.000000e+02 : f32
    %15 = vector.broadcast %cst_8 : f32 to vector<1x128xf32>
    %16 = arith.select %10, %5, %15 : vector<1x128xi1>, vector<1x128xf32>
    %cst_9 = arith.constant -1.000000e+02 : f32
    %cst_10 = arith.constant 1.000000e+02 : f32
    %17 = vector.broadcast %cst_9 : f32 to vector<1x128xf32>
    %18 = arith.maximumf %17, %16 : vector<1x128xf32>
    %19 = vector.broadcast %cst_10 : f32 to vector<1x128xf32>
    %20 = arith.minimumf %19, %18 : vector<1x128xf32>
    %cst_11 = arith.constant 1.000000e+02 : f32
    %21 = vector.broadcast %cst_11 : f32 to vector<1x128xf32>
    %22 = arith.select %14, %21, %20 : vector<1x128xi1>, vector<1x128xf32>
    %c0_12 = arith.constant 0 : index
    %c0_13 = arith.constant 0 : index
    %23 = vector.load %arg5[%c0_12, %c0_13] : memref<1x128xf32, #tpu.memory_space<vmem>>, vector<1x128xf32>
    tpu.vector_store %arg5[%c0_12, %c0_13], %22 {strides = array<i32>} : memref<1x128xf32, #tpu.memory_space<vmem>>, vector<1x128xf32>,
    %cst_14 = arith.constant 0.000000e+00 : f32
    %24 = vector.broadcast %cst_14 : f32 to vector<1x128xf32>
    %25 = arith.subf %24, %5 : vector<1x128xf32>
    %26 = arith.select %14, %25, %5 : vector<1x128xi1>, vector<1x128xf32>
    %cst_15 = arith.constant 0.000000e+00 : f32
    %27 = vector.broadcast %cst_15 : f32 to vector<1x128xf32>
    %28 = arith.maximumf %26, %27 : vector<1x128xf32>
    %29 = math.absf %26 : vector<1x128xf32>
    %cst_16 = arith.constant 0.000000e+00 : f32
    %30 = vector.broadcast %cst_16 : f32 to vector<1x128xf32>
    %31 = arith.subf %30, %29 : vector<1x128xf32>
    %32 = math.exp %31 : vector<1x128xf32>
    %cst_17 = arith.constant 1.000000e+00 : f32
    %33 = vector.broadcast %cst_17 : f32 to vector<1x128xf32>
    %34 = arith.addf %33, %32 : vector<1x128xf32>
    %35 = math.log %34 : vector<1x128xf32>
    %36 = arith.addf %28, %35 : vector<1x128xf32>
    %cst_18 = arith.constant 0.000000e+00 : f32
    %37 = vector.broadcast %cst_18 : f32 to vector<1x128xf32>
    %38 = arith.select %10, %36, %37 : vector<1x128xi1>, vector<1x128xf32>
    %cst_19 = arith.constant dense<0.000000e+00> : vector<1xf32>
    %39 = vector.multi_reduction <add>, %38, %cst_19 [1] : vector<1x128xf32> to vector<1xf32>
    %40 = vector.shape_cast %39 : vector<1xf32> to vector<1x1xf32>
    %41 = vector.shape_cast %40 : vector<1x1xf32> to vector<1x1xf32>
    %42 = vector.broadcast %41 : vector<1x1xf32> to vector<1x128xf32>
    %c0_20 = arith.constant 0 : index
    %c0_21 = arith.constant 0 : index
    %43 = vector.load %arg6[%c0_20, %c0_21] : memref<1x128xf32, #tpu.memory_space<vmem>>, vector<1x128xf32>
    tpu.vector_store %arg6[%c0_20, %c0_21], %42 {strides = array<i32>} : memref<1x128xf32, #tpu.memory_space<vmem>>, vector<1x128xf32>,
    return
  }
  func.func @transform_0(%arg0: i32) -> (i32, i32) {
    %c0_i32 = arith.constant 0 : i32
    %c0_i32_0 = arith.constant 0 : i32
    return %arg0, %c0_i32 : i32, i32
  }
  func.func @transform_1(%arg0: i32) -> (i32, i32) {
    %c0_i32 = arith.constant 0 : i32
    %c0_i32_0 = arith.constant 0 : i32
    %c0_i32_1 = arith.constant 0 : i32
    return %c0_i32, %c0_i32_0 : i32, i32
  }
  func.func @transform_2(%arg0: i32) -> (i32, i32) {
    %c0_i32 = arith.constant 0 : i32
    %c0_i32_0 = arith.constant 0 : i32
    %c0_i32_1 = arith.constant 0 : i32
    return %c0_i32, %c0_i32_0 : i32, i32
  }
  func.func @transform_3(%arg0: i32) -> (i32, i32) {
    %c0_i32 = arith.constant 0 : i32
    %c0_i32_0 = arith.constant 0 : i32
    return %c0_i32, %arg0 : i32, i32
  }
  func.func @transform_4(%arg0: i32) -> (i32, i32) {
    %c0_i32 = arith.constant 0 : i32
    %c0_i32_0 = arith.constant 0 : i32
    return %c0_i32, %arg0 : i32, i32
  }
  func.func @transform_5(%arg0: i32) -> (i32, i32) {
    %c0_i32 = arith.constant 0 : i32
    %c0_i32_0 = arith.constant 0 : i32
    return %c0_i32, %arg0 : i32, i32
  }
}

</mosaic_0001>

<bundles_post_ra>
// kernel: tpu_custom_call.1
= control target key start
LH: loop header
LB: loop body
LE: loop exit
PB: predicated region body
PF: predicated region fallthrough
CT: control target
= control target key end

     0   :  { %12 = vsyncpa [#allocation4], 0  ;;  %s533_s0 = inlined_call_operand.hbm [shape: f32[16,32], index: 0, kind: input, shape index: {}]   ;;  %s534_s1 = inlined_call_operand.vmem [shape: f32[1,32], index: 1, kind: input, shape index: {}]   ;;  %s535_s2 = inlined_call_operand.<no memory space> [shape: f32[1,1], index: 2, kind: input, shape index: {}]   ;;  %s536_s3 = inlined_call_operand.vmem [shape: s32[1,128], index: 3, kind: input, shape index: {}]   ;;  %s537_s4 = inlined_call_operand.hbm [shape: f32[1,128], index: 4, kind: output, shape index: {0}]   ;;  %s538_s5 = inlined_call_operand.hbm [shape: f32[1,128], index: 5, kind: output, shape index: {1}]  }
   0x1   :  { %13 = vsyncpa [#allocation5], 0 }
   0x2   :  { %14 = vsyncpa [#allocation8], 0 }
   0x3   :  { %19 = vsyncadd [#allocation4], 1792  ;;  %s419_s18 = smov [#allocation3]   ;;  %s347_s22 = scalar_lea.hbm %s533_s0, 256 }
   0x4   :  { %s20_s19 = sshll.u32 %s419_s18, 4  ;;  %p348_p0 = scmp.ne.s32.totalorder %s533_s0, %s347_s22  ;;  %s21_s19 = int_to_ptr.vmem [resolvable:$true] %s20_s19 }
   0x5   :  { %p351_p1 = scmp.lt.u32.totalorder %s347_s22, %s533_s0 }
   0x7   :  { %p353_p2 = pnand %p351_p1, %p348_p0 }
   0x9   :  { %356 = shalt.err (!%p353_p2)
}
   0xa   :  { %s357_s27 = scalar_lea.vmem %s21_s19, 256  ;;  %s361_s28 = scalar_lea.vmem %s21_s19, 2048 }
   0xb   :  { %p358_p3 = scmp.ne.s32.totalorder %s21_s19, %s357_s27  ;;  %p362_p4 = scmp.lt.s32.totalorder %s21_s19, %s21_s19 }
   0xc   :  { %p363_p5 = scmp.lt.s32.totalorder %s361_s28, %s357_s27 }
   0xe   :  { %p364_p6 = por %p363_p5, %p362_p4 }
  0x10   :  { %p365_p7 = pnand %p364_p6, %p358_p3 }
  0x12   :  { %368 = shalt.err (!%p365_p7)
}
  0x13   :  { %s420_s29 = smov 128   ;;  %s421_s30 = smov 8  }
  0x14   :  { %26 = dma.hbm_to_vmem [thread:$0]  %s533_s0, 256, %s21_s19, [#allocation4], %s420_s29, %s420_s29, %s421_s30  }
  0x15   :  { %413 = dma.done.wait [#allocation4], 2048  }
  0x16   :  { %414 = vsyncadd [#allocation4], 4294965248  ;;  %v422_v0 = vmov 0.0|0.0   ;;  %vm423_vm0 = vmmov 0   ;;  %v424_v1 = vmov 0.0   ;;  %vm55_vm1 = vcmask 261120  }
  0x17   :  { %303 = vmatprep.subr.bf16.mxu0 %v422_v0  ;;  %300 = vmatprep.mubr.msk.f32.mxu0 %vm423_vm0, %v424_v1  ;;  %v37_v2 = vld [vmem:[#allocation3] sm:$0xff]  ;;  %v38_v3 = vld [vmem:[#allocation3 + $0x8] sm:$0xff]  ;;  %vm471_vm2 = vmpackc.low %vm55_vm1, %vm55_vm1  ;;  %v54_v30 = vstv %s535_s2  ;;  %vm199_vm5 = vcmask 1040384  }
  0x18   :  { %v304_v5 = vpack.c.bf16 %v38_v3, %v37_v2  ;;  %v39_v6 = vld [vmem:[#allocation3 + $0x10] sm:$0xff]  ;;  %v40_v7 = vld [vmem:[#allocation3 + $0x18] sm:$0xff]  ;;  %v41_v9 = vld [vmem:[#allocation3 + $0x20] sm:$0xff] }
  0x19   :  { %v308_v8 = vpack.c.bf16 %v40_v7, %v39_v6  ;;  %v42_v10 = vld [vmem:[#allocation3 + $0x28] sm:$0xff]  ;;  %v43_v12 = vld [vmem:[#allocation3 + $0x30] sm:$0xff]  ;;  %v44_v13 = vld [vmem:[#allocation3 + $0x38] sm:$0xff] }
  0x1a   :  { %306 = vmatpush3.bf16.xpose.msk.msra.mxu0 %vm471_vm2, %v304_v5  ;;  %v312_v11 = vpack.c.bf16 %v42_v10, %v41_v9  ;;  %v316_v14 = vpack.c.bf16 %v44_v13, %v43_v12  ;;  %v45_v15 = vld [vmem:[#allocation3 + $0x40] sm:$0xff]  ;;  %v46_v16 = vld [vmem:[#allocation3 + $0x48] sm:$0xff]  ;;  %v47_v18 = vld [vmem:[#allocation3 + $0x50] sm:$0xff] }
  0x1b   :  { %307 = vmatprep.subr.bf16.mxu0 %v422_v0  ;;  %v320_v17 = vpack.c.bf16 %v46_v16, %v45_v15  ;;  %v48_v19 = vld [vmem:[#allocation3 + $0x58] sm:$0xff]  ;;  %v49_v21 = vld [vmem:[#allocation3 + $0x60] sm:$0xff]  ;;  %v50_v22 = vld [vmem:[#allocation3 + $0x68] sm:$0xff] }
  0x1c   :  { %v324_v20 = vpack.c.bf16 %v48_v19, %v47_v18  ;;  %v328_v23 = vpack.c.bf16 %v50_v22, %v49_v21  ;;  %v51_v24 = vld [vmem:[#allocation3 + $0x70] sm:$0xff]  ;;  %v52_v25 = vld [vmem:[#allocation3 + $0x78] sm:$0xff]  ;;  %v36_v27 = vld [vmem:[%s534_s1] sm:$0x1]  ;;  %s425_s1 = smov [#allocation6]  }
  0x1d   :  { %v332_v26 = vpack.c.bf16 %v52_v25, %v51_v24  ;;  %v177_v28 = vld [vmem:[%s536_s3] sm:$0x1]  ;;  %s210_s2 = sshll.u32 %s425_s1, 4  ;;  %s211_s2 = int_to_ptr.vmem [resolvable:$true] %s210_s2 }
  0x1e   :  { %v178_v29 = vand.u32 1, %v177_v28  ;;  %v180_v31 = vand.u32 2, %v177_v28  ;;  %s369_s3 = scalar_lea.vmem %s211_s2, 16  ;;  %s373_s13 = scalar_lea.vmem %s211_s2, 32 }
  0x1f   :  { %p370_p8 = scmp.ne.s32.totalorder %s211_s2, %s369_s3  ;;  %p374_p9 = scmp.lt.s32.totalorder %s211_s2, %s211_s2 }
  0x20   :  { %vm501_vm3 = vcmp.gt.s32.totalorder %v178_v29, 0  ;;  %vm181_vm4 = vcmp.gt.s32.totalorder %v180_v31, 0  ;;  %p375_p10 = scmp.lt.s32.totalorder %s373_s13, %s369_s3 }
  0x22   :  { %310 = vmatpush3.bf16.xpose.msk.msra.mxu0 %vm471_vm2, %v308_v8  ;;  %p376_p11 = por %p375_p10, %p374_p9 }
  0x23   :  { %311 = vmatprep.subr.bf16.mxu0 %v422_v0 }
  0x24   :  { %p377_p12 = pnand %p376_p11, %p370_p8 }
  0x2a   :  { %314 = vmatpush3.bf16.xpose.msk.msra.mxu0 %vm471_vm2, %v312_v11 }
  0x2b   :  { %315 = vmatprep.subr.bf16.mxu0 %v422_v0 }
  0x32   :  { %318 = vmatpush3.bf16.xpose.msk.msra.mxu0 %vm471_vm2, %v316_v14 }
  0x33   :  { %319 = vmatprep.subr.bf16.mxu0 %v422_v0 }
  0x3a   :  { %322 = vmatpush3.bf16.xpose.msk.msra.mxu0 %vm471_vm2, %v320_v17 }
  0x3b   :  { %323 = vmatprep.subr.bf16.mxu0 %v422_v0 }
  0x42   :  { %326 = vmatpush3.bf16.xpose.msk.msra.mxu0 %vm471_vm2, %v324_v20 }
  0x43   :  { %327 = vmatprep.subr.bf16.mxu0 %v422_v0 }
  0x4a   :  { %330 = vmatpush3.bf16.xpose.msk.msra.mxu0 %vm471_vm2, %v328_v23 }
  0x4b   :  { %331 = vmatprep.subr.bf16.mxu0 %v422_v0 }
  0x52   :  { %334 = vmatpush3.bf16.xpose.msk.msra.mxu0 %vm471_vm2, %v332_v26 }
  0x59   :  { %301 = vmatmul.mubr.msk.f32.vlgmr.msra.gmra.mrb[0].mxu0 %vm55_vm1, %v36_v27 }
 0x12c   :  { %v173_v32 = vpop.f32.mrb[0].mxu0 }
 0x12d   :  { %v174_v34 = vadd.f32 %v173_v32, %v54_v30  ;;  %v302_v35 = vpop.f32.mrb[1].mxu0 }
 0x12f   :  { %v187_v36 = vsub.f32 0.0, %v174_v34  ;;  %v182_v37 = vsel %vm501_vm3, %v174_v34, -100.0 }
 0x130   :  { %v250_v38 = vclamps-f32 %v182_v37, 100.0 }
 0x131   :  { %v188_v39 = vsel %vm181_vm4, %v187_v36, %v174_v34 }
 0x132   :  { %v190_v40 = vand.u32 2147483647, %v188_v39  ;;  %v185_v41 = vsel %vm181_vm4, 100.0, %v250_v38  ;;  %v189_v47 = vmax.f32 %v188_v39, 0.0 }
 0x133   :  { %186 = vst [vmem:[#allocation6] sm:$0x1] %v185_v41 }
 0x134   :  { %v191_v42 = vsub.f32 0.0, %v190_v40 }
 0x136   :  { %v192_v43 = vmul.f32 1.442695, %v191_v42 }
 0x138   :  { %343 = vpow2.f32 %v192_v43 }
 0x142   :  { %v344_v44 = vpop.eup %343 }
 0x143   :  { %v194_v45 = vadd.f32 1.0, %v344_v44 }
 0x145   :  { %345 = vlog2.f32 %v194_v45 }
 0x14f   :  { %v346_v46 = vpop.eup %345 }
 0x150   :  { %v196_v48 = vmul.f32 0.6931472, %v346_v46 }
 0x152   :  { %v197_v49 = vadd.f32 %v196_v48, %v189_v47 }
 0x154   :  { %v198_v50 = vsel %vm501_vm3, %v197_v49, 0.0 }
 0x155   :  { %v200_v51 = vsel %vm199_vm5, %v198_v50, 0.0 }
 0x156   :  { %201 = vadd.xlane.f32.xlu0 %v200_v51 }
 0x157   :  { %380 = shalt.err (!%p377_p12)
}
 0x158   :  { %s381_s16 = scalar_lea.hbm %s537_s4, 16 }
 0x159   :  { %p382_p13 = scmp.ne.s32.totalorder %s537_s4, %s381_s16  ;;  %p385_p0 = scmp.lt.u32.totalorder %s381_s16, %s537_s4 }
 0x15b   :  { %p387_p1 = pnand %p385_p0, %p382_p13 }
 0x15d   :  { %390 = shalt.err (!%p387_p1)
}
 0x15e   :  { %213 = dma.vmem_to_hbm [thread:$0]  %s211_s2, 16, %s537_s4, [#allocation5]  }
 0x15f   :  { %s426_s23 = smov [#allocation7]  }
 0x160   :  { %s220_s24 = sshll.u32 %s426_s23, 4  ;;  %s221_s24 = int_to_ptr.vmem [resolvable:$true] %s220_s24 }
 0x161   :  { %s391_s25 = scalar_lea.vmem %s221_s24, 16  ;;  %s395_s26 = scalar_lea.vmem %s221_s24, 32 }
 0x162   :  { %p392_p2 = scmp.ne.s32.totalorder %s221_s24, %s391_s25  ;;  %p396_p3 = scmp.lt.s32.totalorder %s221_s24, %s221_s24 }
 0x163   :  { %p397_p4 = scmp.lt.s32.totalorder %s395_s26, %s391_s25 }
 0x165   :  { %p398_p5 = por %p397_p4, %p396_p3 }
 0x167   :  { %p399_p6 = pnand %p398_p5, %p392_p2 }
 0x1e3   :  { %v202_v52 = vpop.xlane.xlu0 %201 }
 0x1e4   :  { %203 = vst [vmem:[#allocation7] sm:$0x1] %v202_v52 }
 0x1e5   :  { %402 = shalt.err (!%p399_p6)
}
 0x1e6   :  { %s403_s29 = scalar_lea.hbm %s538_s5, 16 }
 0x1e7   :  { %p404_p7 = scmp.ne.s32.totalorder %s538_s5, %s403_s29  ;;  %p407_p8 = scmp.lt.u32.totalorder %s403_s29, %s538_s5 }
 0x1e9   :  { %p409_p9 = pnand %p407_p8, %p404_p7 }
 0x1eb   :  { %412 = shalt.err (!%p409_p9)
}
 0x1ec   :  { %223 = dma.vmem_to_hbm [thread:$0]  %s221_s24, 16, %s538_s5, [#allocation8]  }
 0x1ed   :  { %415 = dma.done.wait [#allocation5], 16  }
 0x1ee   :  { %416 = vsyncadd [#allocation5], 4294967280 }
 0x1ef   :  { %417 = dma.done.wait [#allocation8], 16  }
 0x1f0   :  { %418 = vsyncadd [#allocation8], 4294967280 }
 0x1f1   :  { %230 = vsyncpa [#allocation4], 1 }
 0x1f2   :  { %231 = vsyncpa [#allocation5], 1 }
 0x1f3   :  { %232 = vsyncpa [#allocation8], 1 }

</bundles_post_ra>
